<compile_context>
chip_gen: v7x
topology: tpu7x:2x2x1
jax: 0.10.0
libtpu: 0.0.40
codegen_flags: <defaults>
</compile_context>

<pallas_src>
import math

import jax
import jax.numpy as jnp
from jax import lax
from jax.experimental import pallas as pl
from jax.experimental.pallas import tpu as pltpu

LANE = 128                         # vreg lane width
ACC_ROWS = 64                      # (64, 128) f32 accumulator = 32 KiB = 8 vregs
_INV_LN2 = 1.0 / math.log(2.0)
_MIB = 1024 * 1024


def _device_kind() -> str:
    try:
        return jax.devices()[0].device_kind.lower()
    except Exception:
        return ""


def _chip_params(kind: str):
    """Returns (input tile budget bytes, vmem_limit_bytes or None, TensorCores/device)."""
    if "v5 lite" in kind or "v5e" in kind or "v5litepod" in kind:
        # v5e: 16 MiB scoped-VMEM default -> keep 2 x 4 MiB double buffer.
        return 4 * _MIB, None, 1
    if "v6 lite" in kind or "v6e" in kind:
        return 8 * _MIB, 32 * _MIB, 1
    if "v7" in kind or "7x" in kind:
        return 8 * _MIB, 32 * _MIB, 2          # dual TensorCore
    if "v4" in kind or "v5p" in kind or "v5" in kind:
        return 8 * _MIB, 32 * _MIB, 2          # megacore
    return 4 * _MIB, None, 1                   # unknown device: stay conservative


def _make_kernel(tile_rows, acc_rows, tiles_per_core, valid_rows, any_masked):
    num_chunks = tile_rows // acc_rows

    def kernel(x_ref, o_ref, acc_ref):
        c = pl.program_id(0)     # TensorCore split (parallel axis)
        i = pl.program_id(1)     # row-tile index within this core (arbitrary axis)

        @pl.when(i == 0)
        def _init():
            acc_ref[...] = jnp.zeros_like(acc_ref)

        t = c * tiles_per_core + i          # un-clamped global tile index
        row0 = t * tile_rows                # first global row of this tile

        def one_chunk(off, masked):
            chunk = x_ref[pl.ds(off, acc_rows), :].astype(jnp.float32)
            if masked:
                # Rows past the end of the real data (ragged last tile and the
                # clamped duplicate tiles on the split axis) become 1.0, so
                # they contribute log(1) == 0.  Masking happens BEFORE the log.
                rows = row0 + off + lax.broadcasted_iota(jnp.int32, chunk.shape, 0)
                chunk = jnp.where(rows < valid_rows, chunk, 1.0)
            return jnp.log(chunk)           # natural log on the EUP

        def tile_sum(masked):
            # Partial sum carried in vregs across the chunk loop; acc_ref is
            # read/written only once per grid step.
            if num_chunks == 1:
                return one_chunk(0, masked)

            def body(j, part):
                off = pl.multiple_of(j * acc_rows, acc_rows)
                return part + one_chunk(off, masked)

            return lax.fori_loop(0, num_chunks, body,
                                 jnp.zeros((acc_rows, LANE), jnp.float32))

        if any_masked:
            # Only ragged / clamped-duplicate tiles pay for the mask.
            is_ragged = (t + 1) * tile_rows > valid_rows

            @pl.when(jnp.logical_not(is_ragged))
            def _full():
                acc_ref[...] += tile_sum(False)

            @pl.when(is_ragged)
            def _tail():
                acc_ref[...] += tile_sum(True)
        else:
            acc_ref[...] += tile_sum(False)

        @pl.when(i == pl.num_programs(1) - 1)
        def _finalize():
            # Scaled partial only; the tiny cross-lane reduce (a few thousand
            # elements) happens in XLA on the wrapper side.
            o_ref[...] = (acc_ref[...] * (-_INV_LN2)).reshape(o_ref.shape)

    return kernel


def neg_log2_sum(likelihoods: jax.Array) -> jax.Array:
    """Compute -sum(log2(likelihoods)) with a tiled Pallas reduction kernel."""
    flat = likelihoods.reshape(-1)           # free for contiguous input, dtype kept
    n = flat.shape[0]
    if n == 0:
        return jnp.float32(0.0)
    if n % LANE != 0:
        # Rare fallback (does a copy): pad with 1.0 (log2(1) == 0) so the
        # lane-dense reshape below is valid.
        flat = jnp.pad(flat, (0, LANE - n % LANE), constant_values=1.0)
    total_rows = flat.shape[0] // LANE
    x2 = flat.reshape(total_rows, LANE)      # lane-dense slab, original dtype

    itemsize = jnp.dtype(x2.dtype).itemsize
    sublane = max(8, 32 // max(1, itemsize))  # 8 f32 / 16 bf16 / 32 int8-fp8

    kind = _device_kind()
    tile_budget, vmem_limit, n_cores = _chip_params(kind)

    if total_rows < ACC_ROWS:
        # Tiny input: one block covering the sublane-rounded slab exactly.
        acc_rows = -(-total_rows // sublane) * sublane
        if acc_rows != total_rows:
            # Pad a handful of rows with 1.0 so block shape == full array dims.
            x2 = jnp.pad(x2, ((0, acc_rows - total_rows), (0, 0)),
                         constant_values=1.0)
            total_rows = acc_rows
        tile_rows = acc_rows
    else:
        acc_rows = ACC_ROWS
        max_tile_rows = max(
            acc_rows, (tile_budget // (LANE * itemsize)) // acc_rows * acc_rows)
        # tile_rows is a multiple of acc_rows (hence of any sublane packing)
        # and never exceeds the array, so blocks never overhang the data.
        tile_rows = min(max_tile_rows, (total_rows // acc_rows) * acc_rows)

    n_row_tiles = pl.cdiv(total_rows, tile_rows)
    splits = n_cores if (n_cores > 1 and n_row_tiles > 1) else 1
    tiles_per_core = pl.cdiv(n_row_tiles, splits)
    any_masked = splits * tiles_per_core * tile_rows > total_rows

    def x_index_map(c, i):
        t = c * tiles_per_core + i
        # Clamp fully out-of-range duplicate tiles (odd tile counts on the
        # split axis) onto the last valid tile; the in-kernel row mask zeroes
        # their contribution.
        return (jnp.minimum(t, n_row_tiles - 1), 0)

    out = pl.pallas_call(
        _make_kernel(tile_rows, acc_rows, tiles_per_core, total_rows, any_masked),
        out_shape=jax.ShapeDtypeStruct((splits, acc_rows, LANE), jnp.float32),
        grid_spec=pltpu.PrefetchScalarGridSpec(
            num_scalar_prefetch=0,
            grid=(splits, tiles_per_core),
            in_specs=[pl.BlockSpec((tile_rows, LANE), x_index_map)],
            out_specs=pl.BlockSpec((1, acc_rows, LANE), lambda c, i: (c, 0, 0)),
            scratch_shapes=[pltpu.VMEM((acc_rows, LANE), jnp.float32)],
        ),
        # TODO(synk): on v7x, verify with a profile that the leading "parallel"
        # axis really lands on both TensorCores; if not, switch to CORE_PARALLEL.
        compiler_params=pltpu.CompilerParams(
            dimension_semantics=("parallel", "arbitrary"),
            vmem_limit_bytes=vmem_limit,
        ),
    )(x2)
    # Each output block holds a per-core partial already scaled by -1/ln2;
    # the final few-thousand-element reduce is trivial in XLA.
    return jnp.sum(out)


class BppLossOrig:
    """JAX/Pallas port of the PyTorch BppLossOrig module (forward only)."""

    def __init__(self, entropy_module_path, input_sizes, reduction="mean"):
        self.entropy_module_path = entropy_module_path
        self.reduction = reduction
        if isinstance(input_sizes, (tuple, list)):
            self.input_h, self.input_w = input_sizes
        else:
            self.input_h = self.input_w = input_sizes

    def __call__(self, student_io_dict, teacher_io_dict=None, targets=None,
                 *args, **kwargs):
        entropy_module_dict = student_io_dict[self.entropy_module_path]
        eb_output = entropy_module_dict["output"]
        if isinstance(eb_output, tuple) and len(eb_output) == 2:
            _, likelihoods = eb_output
        elif isinstance(eb_output, dict) and "likelihoods" in eb_output:
            likelihoods = eb_output["likelihoods"]
        else:
            raise ValueError(
                f"Unexpected output format from entropy_bottleneck at "
                f"{self.entropy_module_path}")

        if isinstance(likelihoods, dict) and "y" in likelihoods:
            likelihoods_y = likelihoods["y"]
        else:
            likelihoods_y = likelihoods
        n = likelihoods_y.shape[0]

        total = neg_log2_sum(likelihoods_y)  # Pallas kernel: -sum(log2(.))
        if self.reduction == "sum":
            bpp = total
        elif self.reduction == "batchmean":
            bpp = total / n                  # flatten(1).sum(1).mean() == total / N
        elif self.reduction == "mean":
            bpp = total / (n * self.input_h * self.input_w)
        else:
            raise Exception(f"Reduction: {self.reduction} does not exist")
        return bpp


if __name__ == "__main__":
    key = jax.random.PRNGKey(0)

    # --- Small demo consistent with the module (NCHW likelihoods) -----------
    N, C, H, W = 2, 4, 16, 16
    likelihoods = jax.random.uniform(
        key, (N, C, H, W), dtype=jnp.float32, minval=1e-3, maxval=1.0)

    student_io = {
        "entropy_bottleneck": {
            # (y_hat, likelihoods) tuple, like compressai's EntropyBottleneck
            "output": (jnp.zeros_like(likelihoods), likelihoods),
        }
    }

    loss_fn = BppLossOrig("entropy_bottleneck", (H, W), reduction="mean")
    bpp = jax.block_until_ready(loss_fn(student_io, None, None))

    ref_total = -jnp.sum(jnp.log2(likelihoods))
    ref_mean = ref_total / (N * H * W)
    assert jnp.allclose(bpp, ref_mean, rtol=1e-5, atol=1e-4), (bpp, ref_mean)

    bpp_sum = BppLossOrig("entropy_bottleneck", (H, W), "sum")(student_io)
    bpp_bm = BppLossOrig("entropy_bottleneck", (H, W), "batchmean")(student_io)
    assert jnp.allclose(bpp_sum, ref_total, rtol=1e-5, atol=1e-3)
    assert jnp.allclose(bpp_bm, ref_total / N, rtol=1e-5, atol=1e-3)

    # --- Multi-chunk f32 check ------------------------------------------------
    big = jax.random.uniform(
        jax.random.PRNGKey(1), (2, 33, 128, 128), dtype=jnp.float32,
        minval=1e-3, maxval=1.0)
    got_big = jax.block_until_ready(neg_log2_sum(big))
    ref_big = -jnp.sum(jnp.log2(big))
    assert jnp.allclose(got_big, ref_big, rtol=5e-4), (got_big, ref_big)

    # --- Multi-tile + ragged tail (mask path) on any chip ---------------------
    ragged = jax.random.uniform(
        jax.random.PRNGKey(2), (3, 47, 129, 128), dtype=jnp.float32,
        minval=1e-3, maxval=1.0)
    got_rag = jax.block_until_ready(neg_log2_sum(ragged))
    ref_rag = -jnp.sum(jnp.log2(ragged))
    assert jnp.allclose(got_rag, ref_rag, rtol=5e-4), (got_rag, ref_rag)

    # --- bf16 input (packed-dtype sublane tiling) ------------------------------
    small_bf16 = jax.random.uniform(
        jax.random.PRNGKey(3), (2, 4, 16, 32), dtype=jnp.float32,
        minval=1e-3, maxval=1.0).astype(jnp.bfloat16)
    got_bf16 = jax.block_until_ready(neg_log2_sum(small_bf16))
    ref_bf16 = -jnp.sum(jnp.log2(small_bf16.astype(jnp.float32)))
    assert jnp.allclose(got_bf16, ref_bf16, rtol=1e-4), (got_bf16, ref_bf16)

    # --- Non-multiple-of-128 element count (wrapper pad fallback) --------------
    odd = jax.random.uniform(
        jax.random.PRNGKey(4), (2, 3, 17, 19), dtype=jnp.float32,
        minval=1e-3, maxval=1.0)
    got_odd = jax.block_until_ready(neg_log2_sum(odd))
    ref_odd = -jnp.sum(jnp.log2(odd))
    assert jnp.allclose(got_odd, ref_odd, rtol=1e-4), (got_odd, ref_odd)

    print("KERNEL_OK")
</pallas_src>

<mosaic_0001>
module attributes {stable_mosaic.version = 11 : i64} {
  func.func @kernel(%arg0: i32, %arg1: i32, %arg2: memref<16x128xf32, #tpu.memory_space<vmem>>, %arg3: memref<1x16x128xf32, #tpu.memory_space<vmem>>, %arg4: memref<16x128xf32, #tpu.memory_space<vmem>>) attributes {dimension_semantics = [#tpu.dimension_semantics<parallel>, #tpu.dimension_semantics<arbitrary>], iteration_bounds = array<i64: 1, 1>, scalar_prefetch = 0 : i64, scratch_operands = 1 : i64, tpu.core_type = #tpu.core_type<tc>, window_params = [{transform_indices = @transform_0, window_bounds = array<i64: 16, 128>}, {transform_indices = @transform_1, window_bounds = array<i64: 1, 16, 128>}]} {
    %c0_i32 = arith.constant 0 : i32
    %0 = arith.cmpi eq, %arg1, %c0_i32 : i32
    %1 = arith.extui %0 : i1 to i32
    %c0_i32_0 = arith.constant 0 : i32
    %2 = arith.cmpi ne, %1, %c0_i32_0 : i32
    scf.if %2 {
      %cst = arith.constant 0.000000e+00 : f32
      %11 = vector.broadcast %cst : f32 to vector<16x128xf32>
      %c0_8 = arith.constant 0 : index
      %c0_9 = arith.constant 0 : index
      %12 = vector.load %arg4[%c0_8, %c0_9] : memref<16x128xf32, #tpu.memory_space<vmem>>, vector<16x128xf32>
      tpu.vector_store %arg4[%c0_8, %c0_9], %11 {strides = array<i32>} : memref<16x128xf32, #tpu.memory_space<vmem>>, vector<16x128xf32>,
    } else {
    }
    %c0 = arith.constant 0 : index
    %c0_1 = arith.constant 0 : index
    %3 = vector.load %arg4[%c0, %c0_1] : memref<16x128xf32, #tpu.memory_space<vmem>>, vector<16x128xf32>
    %c0_2 = arith.constant 0 : index
    %c0_3 = arith.constant 0 : index
    %4 = vector.load %arg2[%c0_2, %c0_3] : memref<16x128xf32, #tpu.memory_space<vmem>>, vector<16x128xf32>
    %5 = math.log %4 : vector<16x128xf32>
    %6 = arith.addf %3, %5 : vector<16x128xf32>
    %c0_4 = arith.constant 0 : index
    %c0_5 = arith.constant 0 : index
    %7 = vector.load %arg4[%c0_4, %c0_5] : memref<16x128xf32, #tpu.memory_space<vmem>>, vector<16x128xf32>
    tpu.vector_store %arg4[%c0_4, %c0_5], %6 {strides = array<i32>} : memref<16x128xf32, #tpu.memory_space<vmem>>, vector<16x128xf32>,
    %c0_i32_6 = arith.constant 0 : i32
    %8 = arith.cmpi eq, %arg1, %c0_i32_6 : i32
    %9 = arith.extui %8 : i1 to i32
    %c0_i32_7 = arith.constant 0 : i32
    %10 = arith.cmpi ne, %9, %c0_i32_7 : i32
    scf.if %10 {
      %c0_8 = arith.constant 0 : index
      %c0_9 = arith.constant 0 : index
      %11 = vector.load %arg4[%c0_8, %c0_9] : memref<16x128xf32, #tpu.memory_space<vmem>>, vector<16x128xf32>
      %cst = arith.constant -1.44269502 : f32
      %12 = vector.broadcast %cst : f32 to vector<16x128xf32>
      %13 = arith.mulf %11, %12 : vector<16x128xf32>
      %14 = vector.shape_cast %13 : vector<16x128xf32> to vector<1x16x128xf32>
      %c0_10 = arith.constant 0 : index
      %c0_11 = arith.constant 0 : index
      %c0_12 = arith.constant 0 : index
      %15 = vector.load %arg3[%c0_10, %c0_11, %c0_12] : memref<1x16x128xf32, #tpu.memory_space<vmem>>, vector<1x16x128xf32>
      tpu.vector_store %arg3[%c0_10, %c0_11, %c0_12], %14 {strides = array<i32>} : memref<1x16x128xf32, #tpu.memory_space<vmem>>, vector<1x16x128xf32>,
    } else {
    }
    return
  }
  func.func @transform_0(%arg0: i32, %arg1: i32) -> (i32, i32) {
    %c1_i32 = arith.constant 1 : i32
    %0 = arith.muli %arg0, %c1_i32 : i32
    %1 = arith.addi %0, %arg1 : i32
    %c0_i32 = arith.constant 0 : i32
    %2 = arith.minsi %1, %c0_i32 : i32
    %c0_i32_0 = arith.constant 0 : i32
    %c0_i32_1 = arith.constant 0 : i32
    return %2, %c0_i32_0 : i32, i32
  }
  func.func @transform_1(%arg0: i32, %arg1: i32) -> (i32, i32, i32) {
    %c0_i32 = arith.constant 0 : i32
    %c0_i32_0 = arith.constant 0 : i32
    %c0_i32_1 = arith.constant 0 : i32
    return %arg0, %c0_i32, %c0_i32_0 : i32, i32, i32
  }
}

</mosaic_0001>

<bundles_post_ra>
// kernel: tpu_custom_call.1
= control target key start
LH: loop header
LB: loop body
LE: loop exit
PB: predicated region body
PF: predicated region fallthrough
CT: control target
= control target key end

     0   :  { %6 = vsyncpa [#allocation4], 0  ;;  %s179_s0 = inlined_call_operand.hbm [shape: f32[16,128], index: 0, kind: input, shape index: {}]   ;;  %s180_s1 = inlined_call_operand.hbm [shape: f32[1,16,128], index: 1, kind: output, shape index: {}]  }
   0x1   :  { %7 = vsyncpa [#allocation5], 0  ;;  %s135_s6 = smov [#allocation3]   ;;  %s87_s10 = scalar_lea.hbm %s179_s0, 256 }
   0x2   :  { %s19_s7 = sshll.u32 %s135_s6, 4  ;;  %p88_p0 = scmp.ne.s32.totalorder %s179_s0, %s87_s10  ;;  %s20_s7 = int_to_ptr.vmem [resolvable:$true] %s19_s7 }
   0x3   :  { %p91_p1 = scmp.lt.u32.totalorder %s87_s10, %s179_s0 }
   0x5   :  { %p93_p2 = pnand %p91_p1, %p88_p0 }
   0x7   :  { %96 = shalt.err (!%p93_p2)
}
   0x8   :  { %s97_s15 = scalar_lea.vmem %s20_s7, 256  ;;  %p102_p4 = scmp.lt.s32.totalorder %s20_s7, %s20_s7 }
   0x9   :  { %p98_p3 = scmp.ne.s32.totalorder %s20_s7, %s97_s15  ;;  %p103_p5 = scmp.lt.s32.totalorder %s97_s15, %s97_s15 }
   0xb   :  { %p104_p6 = por %p103_p5, %p102_p4 }
   0xd   :  { %p105_p7 = pnand %p104_p6, %p98_p3 }
   0xf   :  { %108 = shalt.err (!%p105_p7)
}
  0x10   :  { %s136_s16 = smov 128   ;;  %s137_s17 = smov 8  }
  0x11   :  { %25 = dma.hbm_to_vmem [thread:$0]  %s179_s0, 256, %s20_s7, [#allocation4], %s136_s16, %s136_s16, %s137_s17  }
  0x12   :  { %131 = dma.done.wait [#allocation4], 256  }
  0x13   :  { %132 = vsyncadd [#allocation4], 4294967040  ;;  %v41_v0 = vld [vmem:[#allocation3] sm:$0xff]  ;;  %v42_v1 = vld [vmem:[#allocation3 + $0x8] sm:$0xff]  ;;  %s138_s20 = smov [#allocation6]  }
  0x14   :  { %83 = vlog2.f32 %v41_v0  ;;  %s65_s21 = sshll.u32 %s138_s20, 4  ;;  %s66_s21 = int_to_ptr.vmem [resolvable:$true] %s65_s21 }
  0x15   :  { %85 = vlog2.f32 %v42_v1  ;;  %s109_s22 = scalar_lea.vmem %s66_s21, 256  ;;  %p114_p9 = scmp.lt.s32.totalorder %s66_s21, %s66_s21 }
  0x16   :  { %p110_p8 = scmp.ne.s32.totalorder %s66_s21, %s109_s22  ;;  %p115_p10 = scmp.lt.s32.totalorder %s109_s22, %s109_s22 }
  0x18   :  { %p116_p11 = por %p115_p10, %p114_p9 }
  0x1a   :  { %p117_p12 = pnand %p116_p11, %p110_p8 }
  0x1e   :  { %v84_v2 = vpop.eup %83 }
  0x1f   :  { %v86_v3 = vpop.eup %85  ;;  %v44_v4 = vmul.f32 0.6931472, %v84_v2 }
  0x20   :  { %v46_v5 = vmul.f32 0.6931472, %v86_v3 }
  0x21   :  { %v56_v6 = vmul.f32 -1.442695, %v44_v4 }
  0x22   :  { %v57_v7 = vmul.f32 -1.442695, %v46_v5 }
  0x23   :  { %58 = vst [vmem:[#allocation6] sm:$0xff] %v56_v6 }
  0x24   :  { %59 = vst [vmem:[#allocation6 + $0x8] sm:$0xff] %v57_v7 }
  0x25   :  { %120 = shalt.err (!%p117_p12)
}
  0x26   :  { %s121_s24 = scalar_lea.hbm %s180_s1, 256 }
  0x27   :  { %p122_p13 = scmp.ne.s32.totalorder %s180_s1, %s121_s24  ;;  %p125_p0 = scmp.lt.u32.totalorder %s121_s24, %s180_s1 }
  0x29   :  { %p127_p1 = pnand %p125_p0, %p122_p13 }
  0x2b   :  { %130 = shalt.err (!%p127_p1)
}
  0x2c   :  { %71 = dma.vmem_to_hbm [thread:$0]  %s66_s21, 256, %s180_s1, [#allocation5], %s136_s16, %s136_s16, %s137_s17  }
  0x2d   :  { %133 = dma.done.wait [#allocation5], 256  }
  0x2e   :  { %134 = vsyncadd [#allocation5], 4294967040 }
  0x2f   :  { %75 = vsyncpa [#allocation4], 1 }
  0x30   :  { %76 = vsyncpa [#allocation5], 1 }

</bundles_post_ra>
